<compile_context>
chip_gen: v7x
topology: tpu7x:2x2x1
jax: 0.10.0
libtpu: 0.0.40
codegen_flags: <defaults>
</compile_context>

<pallas_src>
import functools

import jax
import jax.numpy as jnp
from jax.experimental import pallas as pl
from jax.experimental.pallas import tpu as pltpu


def _moving_avg_kernel(x_ref, o_ref, *, kernel_size, stride, pad):
    # x_ref: (L, tc) block -- time on sublane, channels on lane (batch squeezed).
    # o_ref: (L_out, tc)
    x = x_ref[...]                                  # keep input dtype (bf16 stays bf16)
    L, tc = x.shape

    # Fused replicate padding along time (VMEM-only, never touches HBM).
    if pad > 0:
        front = jnp.broadcast_to(x[0:1, :], (pad, tc))
        back = jnp.broadcast_to(x[L - 1:L, :], (pad, tc))
        xp = jnp.concatenate([front, x, back], axis=0)   # (l_pad, tc)
    else:
        xp = x
    l_pad = L + 2 * pad
    n_win = l_pad - kernel_size + 1

    if kernel_size <= 16:
        # Unrolled sliding-window sum with per-tap f32 upcast: peak temps stay
        # ~2 f32 slabs regardless of k.
        acc = xp[0:n_win, :].astype(jnp.float32)
        for j in range(1, kernel_size):
            acc = acc + xp[j:j + n_win, :].astype(jnp.float32)
    else:
        # Large-k path: Hillis-Steele prefix sum along the sublane (time) axis
        # (only static slices / concats / adds -> guaranteed to lower), then a
        # single shifted difference.  O(log L) adds, temps O(1) in k.
        csum = xp.astype(jnp.float32)
        shift = 1
        while shift < l_pad:
            shifted = jnp.concatenate(
                [jnp.zeros((shift, tc), jnp.float32), csum[:l_pad - shift, :]],
                axis=0)
            csum = csum + shifted
            shift *= 2
        csum0 = jnp.concatenate([jnp.zeros((1, tc), jnp.float32), csum], axis=0)
        acc = (csum0[kernel_size:kernel_size + n_win, :] - csum0[0:n_win, :])

    acc = acc * (1.0 / kernel_size)

    # Single strided downsample for stride > 1.  (k strided gathers would not
    # beat k dense adds + one gather while the kernel is HBM-bound.)
    if stride > 1:
        acc = acc[::stride, :]

    o_ref[...] = acc.astype(o_ref.dtype)


def _choose_lane_tile(c_pad, batch, seq_in, l_pad, l_out, itemsize, budget_bytes):
    """Largest lane tile (multiple of 128, divides c_pad) fitting the budget."""

    def block_bytes(tc):
        io = 2 * (seq_in + l_out) * tc * itemsize    # double-buffered in + out blocks
        tmp = 4 * l_pad * tc * 4                     # in-kernel f32 temporaries
        return io + tmp

    tc = 128
    while (tc * 2 <= c_pad and c_pad % (tc * 2) == 0
           and block_bytes(tc * 2) <= budget_bytes):
        tc *= 2
    # v7x has 2 TensorCores: prefer >=4 total grid steps so each core gets
    # pipelined work, but never shrink the lane tile below 512 to do so.
    while tc > 512 and batch * (c_pad // tc) < 4 and c_pad % (tc // 2) == 0:
        tc //= 2
    return tc


def moving_avg(x, kernel_size, stride):
    """x: (B, L, C) -> (B, L_out, C), matching the PyTorch module."""
    B, L, C = x.shape
    pad = (kernel_size - 1) // 2
    l_pad = L + 2 * pad
    l_out = (l_pad - kernel_size) // stride + 1

    # Lane-dense output: pad the channel axis up to a multiple of 128 when
    # needed (padded lanes are independent garbage and sliced off below).
    c_pad = ((C + 127) // 128) * 128
    x_in = x if c_pad == C else jnp.pad(x, ((0, 0), (0, 0), (0, c_pad - C)))

    # Generation-aware VMEM sizing (v5e/v6e: 128 MiB, v7x: 64 MiB per TC).
    try:
        vmem_cap = int(pltpu.get_tpu_info().vmem_capacity_bytes)
    except Exception:
        vmem_cap = 64 * 1024 * 1024
    budget_bytes = vmem_cap // 6
    vmem_limit = min(vmem_cap // 2, 64 * 1024 * 1024)

    itemsize = jnp.dtype(x.dtype).itemsize
    tc = _choose_lane_tile(c_pad, B, L, l_pad, l_out, itemsize, budget_bytes)
    grid = (B, c_pad // tc)

    kernel = functools.partial(
        _moving_avg_kernel, kernel_size=kernel_size, stride=stride, pad=pad)

    cost = pl.CostEstimate(
        flops=B * kernel_size * (l_pad - kernel_size + 1) * c_pad,
        transcendentals=0,
        bytes_accessed=(B * L * c_pad + B * l_out * c_pad) * itemsize,
    )

    out = pl.pallas_call(
        kernel,
        out_shape=jax.ShapeDtypeStruct((B, l_out, c_pad), x.dtype),
        grid_spec=pltpu.PrefetchScalarGridSpec(
            num_scalar_prefetch=0,
            grid=grid,
            in_specs=[pl.BlockSpec((None, L, tc), lambda b, c: (b, 0, c))],
            out_specs=pl.BlockSpec((None, l_out, tc), lambda b, c: (b, 0, c)),
        ),
        compiler_params=pltpu.CompilerParams(
            dimension_semantics=("parallel", "parallel"),
            vmem_limit_bytes=vmem_limit,
        ),
        cost_estimate=cost,
    )(x_in)

    if c_pad != C:
        out = out[:, :, :C]
    return out


def _reference_moving_avg(x, kernel_size, stride):
    # Pure-JAX reference matching the PyTorch forward.
    pad = (kernel_size - 1) // 2
    front = jnp.repeat(x[:, 0:1, :], pad, axis=1)
    end = jnp.repeat(x[:, -1:, :], pad, axis=1)
    xp = jnp.concatenate([front, x, end], axis=1)
    l_pad = xp.shape[1]
    l_out = (l_pad - kernel_size) // stride + 1
    outs = []
    for t in range(l_out):
        outs.append(jnp.mean(xp[:, t * stride:t * stride + kernel_size, :],
                             axis=1, keepdims=True))
    return jnp.concatenate(outs, axis=1)


if __name__ == "__main__":
    key = jax.random.PRNGKey(0)

    # Lane-dense main path: C is a multiple of 128 -> no padding, no transposes.
    B, L, C = 2, 24, 128
    x = jax.random.normal(key, (B, L, C), dtype=jnp.float32)

    configs = [
        (x, 5, 1),      # DLinear-style stride-1, unrolled path
        (x, 7, 2),      # stride > 1 path (single strided downsample)
        (x, 25, 1),     # large-k prefix-sum path (DLinear default kernel=25)
    ]

    # Small non-multiple-of-128 channel count exercises the pad-to-128 fallback.
    x_small = jax.random.normal(jax.random.PRNGKey(1), (2, 16, 7),
                                dtype=jnp.float32)
    configs.append((x_small, 3, 1))

    for xi, k, s in configs:
        out = jax.block_until_ready(moving_avg(xi, k, s))
        ref = _reference_moving_avg(xi, k, s)
        assert out.shape == ref.shape, (out.shape, ref.shape, k, s)
        assert jnp.allclose(out, ref, atol=1e-4, rtol=1e-4), ("mismatch", k, s)

    print("KERNEL_OK")
</pallas_src>

<mosaic_0001>
module attributes {stable_mosaic.version = 11 : i64} {
  func.func @_moving_avg_kernel(%arg0: i32, %arg1: i32, %arg2: memref<1x24x128xf32, #tpu.memory_space<vmem>>, %arg3: memref<1x24x128xf32, #tpu.memory_space<vmem>>) attributes {dimension_semantics = [#tpu.dimension_semantics<parallel>, #tpu.dimension_semantics<parallel>], iteration_bounds = array<i64: 2, 1>, scalar_prefetch = 0 : i64, scratch_operands = 0 : i64, tpu.core_type = #tpu.core_type<tc>, window_params = [{transform_indices = @transform_0, window_bounds = array<i64: 1, 24, 128>}, {transform_indices = @transform_1, window_bounds = array<i64: 1, 24, 128>}]} {
    %c0 = arith.constant 0 : index
    %c0_0 = arith.constant 0 : index
    %c0_1 = arith.constant 0 : index
    %0 = vector.load %arg2[%c0, %c0_0, %c0_1] : memref<1x24x128xf32, #tpu.memory_space<vmem>>, vector<1x24x128xf32>
    %1 = vector.shape_cast %0 : vector<1x24x128xf32> to vector<24x128xf32>
    %2 = vector.extract_strided_slice %1 {offsets = [0, 0], sizes = [1, 128], strides = [1, 1]} : vector<24x128xf32> to vector<1x128xf32>
    %3 = vector.shape_cast %2 : vector<1x128xf32> to vector<1x128xf32>
    %4 = vector.broadcast %3 : vector<1x128xf32> to vector<2x128xf32>
    %5 = vector.extract_strided_slice %1 {offsets = [23, 0], sizes = [1, 128], strides = [1, 1]} : vector<24x128xf32> to vector<1x128xf32>
    %6 = vector.shape_cast %5 : vector<1x128xf32> to vector<1x128xf32>
    %7 = vector.broadcast %6 : vector<1x128xf32> to vector<2x128xf32>
    %8 = tpu.concatenate %4, %1, %7 in 0 : vector<2x128xf32>, vector<24x128xf32>, vector<2x128xf32> -> vector<28x128xf32>
    %9 = vector.extract_strided_slice %8 {offsets = [0, 0], sizes = [24, 128], strides = [1, 1]} : vector<28x128xf32> to vector<24x128xf32>
    %10 = vector.extract_strided_slice %8 {offsets = [1, 0], sizes = [24, 128], strides = [1, 1]} : vector<28x128xf32> to vector<24x128xf32>
    %11 = arith.addf %9, %10 : vector<24x128xf32>
    %12 = vector.extract_strided_slice %8 {offsets = [2, 0], sizes = [24, 128], strides = [1, 1]} : vector<28x128xf32> to vector<24x128xf32>
    %13 = arith.addf %11, %12 : vector<24x128xf32>
    %14 = vector.extract_strided_slice %8 {offsets = [3, 0], sizes = [24, 128], strides = [1, 1]} : vector<28x128xf32> to vector<24x128xf32>
    %15 = arith.addf %13, %14 : vector<24x128xf32>
    %16 = vector.extract_strided_slice %8 {offsets = [4, 0], sizes = [24, 128], strides = [1, 1]} : vector<28x128xf32> to vector<24x128xf32>
    %17 = arith.addf %15, %16 : vector<24x128xf32>
    %cst = arith.constant 2.000000e-01 : f32
    %18 = vector.broadcast %cst : f32 to vector<24x128xf32>
    %19 = arith.mulf %17, %18 : vector<24x128xf32>
    %c0_2 = arith.constant 0 : index
    %c0_3 = arith.constant 0 : index
    %c0_4 = arith.constant 0 : index
    %20 = vector.load %arg3[%c0_2, %c0_3, %c0_4] : memref<1x24x128xf32, #tpu.memory_space<vmem>>, vector<1x24x128xf32>
    %21 = vector.shape_cast %20 : vector<1x24x128xf32> to vector<24x128xf32>
    %22 = vector.shape_cast %19 : vector<24x128xf32> to vector<1x24x128xf32>
    tpu.vector_store %arg3[%c0_2, %c0_3, %c0_4], %22 {strides = array<i32>} : memref<1x24x128xf32, #tpu.memory_space<vmem>>, vector<1x24x128xf32>,
    return
  }
  func.func @transform_0(%arg0: i32, %arg1: i32) -> (i32, i32, i32) {
    %c0_i32 = arith.constant 0 : i32
    %c0_i32_0 = arith.constant 0 : i32
    return %arg0, %c0_i32, %arg1 : i32, i32, i32
  }
  func.func @transform_1(%arg0: i32, %arg1: i32) -> (i32, i32, i32) {
    %c0_i32 = arith.constant 0 : i32
    %c0_i32_0 = arith.constant 0 : i32
    return %arg0, %c0_i32, %arg1 : i32, i32, i32
  }
}

</mosaic_0001>

<bundles_post_ra>
// kernel: tpu_custom_call.1
= control target key start
LH: loop header
LB: loop body
LE: loop exit
PB: predicated region body
PF: predicated region fallthrough
CT: control target
= control target key end

     0   :  { %6 = vsyncpa [#allocation3], 0  ;;  %s746_s0 = inlined_call_operand.hbm [shape: f32[2,24,128], index: 0, kind: input, shape index: {}]   ;;  %s747_s1 = inlined_call_operand.hbm [shape: f32[2,24,128], index: 1, kind: output, shape index: {}]  }
   0x1   :  { %8 = vsyncpa [#allocation3 + $0x1], 0 }
   0x2   :  { %9 = vsyncpa [#allocation4], 0 }
   0x3   :  { %11 = vsyncpa [#allocation4 + $0x1], 0  ;;  %s551_s6 = smov 0   ;;  %s553_s7 = smov 0  }
   0x4   :  { %s555_s8 = smov 0   ;;  %s557_s9 = smov 0  }
   0x5   :  { %s559_s10 = smov 0   ;;  %s561_s11 = smov 0  }
   0x6 LB: > { %s342_s12 = sadd.s32 4294967295, %s533_s11   ;;  %s343_s13 = sadd.s32 4294967294, %s533_s11   ;;  %s533_s11 = sphi %s561_s11, %s17_s11   ;;  %s529_s10 = sphi %s559_s10, %s762_s10   ;;  %s525_s9 = sphi %s557_s9, %s761_s9   ;;  %s521_s8 = sphi %s555_s8, %s760_s8   ;;  %s517_s7 = sphi %s553_s7, %s759_s7   ;;  %s513_s6 = sphi %s551_s6, %s758_s6  }
   0x7   : > { %s29_s14 = sadd.s32 1, %s529_s10  ;;  %s38_s15 = sadd.s32 1, %s521_s8 }
   0x8   : > { %p31_p0 = scmp.ge.s32.totalorder %s29_s14, 2  ;;  %p45_p1 = scmp.ne.s32.totalorder %s521_s8, %s517_s7 }
   0x9   : > { %p46_p2 = scmp.eq.s32.totalorder %s533_s11, 0  ;;  %p51_p3 = scmp.ne.s32.totalorder %s517_s7, %s513_s6 }
   0xa   : > { %s764_s14 = smov (%p31_p0, %s29_s14), 0  ;;  %p52_p5 = scmp.eq.s32.totalorder %s342_s12, 0 }
   0xb   : > { %p592_p4 = por %p46_p2, %p45_p1  ;;  %s33_s17 = ssub.s32 %s529_s10, %s764_s14 }
   0xc   : > { %p77_p6 = scmp.eq.s32.totalorder %s342_s12, 1  ;;  %p36_p7 = scmp.eq.s32.totalorder %s33_s17, 0 }
   0xd   : > { %p598_p8 = por %p52_p5, %p51_p3  ;;  %p83_p10 = scmp.eq.s32.totalorder %s343_s13, 1 }
   0xe   : > { %p602_p9 = por %p77_p6, %p45_p1  ;;  %p367_p13 = scmp.lt.s32.totalorder %s533_s11, 2 }
   0xf   : > { %s607_s20 = scalar_select %p36_p7, %s521_s8, %s38_s15  }
  0x10   : > { %s751_s19 = scalar_select %p602_p9, 1, 0 }
  0x11   : > { %p609_p11 = por %p83_p10, %p51_p3  ;;  %s103_s22 = sand.u32 1, %s521_s8  }
  0x12   : > { %s351_s23 = smul.u32 24, %s103_s22  ;;  %p619_p0 = pnand %p367_p13, %p592_p4 }
  0x13   : > { %s752_s21 = scalar_select %p609_p11, 1, 0 }
  0x14   : > { %s352_s24 = smul.u32 384, %s529_s10  ;;  %s107_s29 = scalar_lea.vmem [#allocation2], %s351_s23 }
  0x15   : > { %s115_s30 = sshll.u32 %s107_s29, 4  ;;  %s631_s2 = scalar_lea.sflag [#allocation3], %s103_s22  ;;  %s628_s30 = int_to_ptr.vmem [resolvable:$true] %s115_s30 }
  0x16   : > { %s626_s28 = scalar_lea.hbm %s746_s0, %s352_s24  ;;  %p423_p3 = pneg %p619_p0 }
  0x17   : > { %s421_s3 = scalar_lea.hbm %s626_s28, 384  ;;  %s426_s12 = scalar_lea.hbm %s746_s0, 768 }
  0x18   : > { %p422_p2 = scmp.ne.s32.totalorder %s626_s28, %s421_s3  ;;  %p427_p6 = scmp.lt.u32.totalorder %s626_s28, %s746_s0 }
  0x19   : > { %p428_p7 = scmp.lt.u32.totalorder %s426_s12, %s421_s3  ;;  %p430_p13 = scmp.lt.u32.totalorder %s421_s3, %s626_s28 }
  0x1a   : > { %p424_p4 = pnand %p423_p3, %p422_p2 }
  0x1b   : > { %p429_p10 = por %p428_p7, %p427_p6 }
  0x1c   : > { %p425_p5 = pneg %p424_p4 }
  0x1d   : > { %p431_p12 = por %p430_p13, %p429_p10 }
  0x1f   : > { %p432_p1 = pnand %p431_p12, %p425_p5 }
  0x21   : > { %435 = shalt.err (!%p432_p1)
}
  0x22   : > { %s436_s16 = scalar_lea.vmem %s628_s30, 384  ;;  %s535_s17 = smov [#allocation2]  }
  0x23   : > { %p437_p2 = scmp.ne.s32.totalorder %s628_s30, %s436_s16  ;;  %s441_s22 = sshll.u32 %s535_s17, 4  ;;  %s442_s22 = int_to_ptr.vmem [resolvable:$false] %s441_s22 }
  0x24   : > { %s443_s23 = scalar_lea.vmem %s442_s22, 768  ;;  %p444_p9 = scmp.lt.s32.totalorder %s628_s30, %s442_s22 }
  0x25   : > { %p439_p4 = pnand %p437_p2, %p423_p3  ;;  %p445_p6 = scmp.lt.s32.totalorder %s443_s23, %s436_s16 }
  0x27   : > { %p440_p11 = pneg %p439_p4  ;;  %p446_p7 = por %p445_p6, %p444_p9 }
  0x29   : > { %p447_p10 = pnand %p446_p7, %p440_p11 }
  0x2b   : > { %450 = shalt.err (!%p447_p10)
}
  0x2c   : > { %s536_s24 = smov 128   ;;  %s537_s26 = smov 8  }
  0x2d   : > { %362 = dma.hbm_to_vmem [thread:$0]  (!%p619_p0), %s626_s28, 384, %s628_s30, %s631_s2, %s536_s24, %s536_s24, %s537_s26  }
  0x2e   : > { %p123_p12 = scmp.lt.s32.totalorder %s533_s11, 3  ;;  %p754_p1 = scmp.ge.s32.totalorder %s533_s11, 1 }
  0x30   : > { %p124_p3 = pnand %p754_p1, %p123_p12 }
  0x31   : > { %s663_s27 = sand.u32 (!%p124_p3), 1, %s517_s7  }
  0x32   : > { %127 = sbr.rel (%p124_p3) target bundleno = 96 (0x60), region = 24  ;;  %s130_s3 = scalar_lea.sflag (!%p124_p3), [#allocation3], %s663_s27 }
  0x33   : > { %s353_s29 = smul.u32 (!%p124_p3), 24, %s663_s27 }
  0x35   : > { %s133_s4 = scalar_lea.vmem (!%p124_p3), [#allocation2], %s353_s29 }
  0x39   : > { %504 = dma.done.wait (%p598_p8), %s130_s3, 384  }
  0x3a   : > { %506 = vsyncadd (%p598_p8), %s130_s3, 4294966912  ;;  %v155_v0 = vlaneseq  ;;  %v152_v4 = vld [vmem:[%s133_s4] sm:$0xff]  ;;  %v153_v5 = vld [vmem:[%s133_s4 + $0x8] sm:$0xff]  ;;  %vm166_vm0 = vcmask 1041408   ;;  %vm180_vm1 = vcmask 1046528   ;;  %vm194_vm2 = vcmask 1045504  }
  0x3b   : > { %v154_v6 = vld [vmem:[%s133_s4 + $0x10] sm:$0xff]  ;;  %v167_v8 = vrot.slane %v152_v4, 6  ;;  %v168_v9 = vrot.slane %v153_v5, 6  ;;  %vm208_vm3 = vcmask 1044480   ;;  %vm222_vm4 = vcmask 1043456   ;;  %s151_s18 = scalar_lea.vmem [#allocation5], %s353_s29 }
  0x3c   : > { %v156_v1 = vshrl.u32 %v155_v0, 7  ;;  %v170_v10 = vrot.slane %v154_v6, 6  ;;  %s257_s25 = sshll.u32 %s151_s18, 4  ;;  %s354_s28 = smul.u32 384, %s525_s9  ;;  %s692_s25 = int_to_ptr.vmem [resolvable:$true] %s257_s25 }
  0x3d   : > { %v169_v11 = vsel %vm166_vm0, %v167_v8, %v168_v9  ;;  %s243_s12 = scalar_lea.sflag [#allocation4], %s663_s27  ;;  %s451_s13 = scalar_lea.vmem %s692_s25, 384 }
  0x3e   : > { %v157_v2 = vsub.s32 0, %v156_v1  ;;  %v161_v3 = vsub.s32 7, %v156_v1  ;;  %v171_v13 = vsel %vm166_vm0, %v168_v9, %v170_v10  ;;  %v182_v16 = vrot.slane %v169_v11, 1  ;;  %s697_s5 = scalar_lea.hbm %s747_s1, %s354_s28  ;;  %p452_p8 = scmp.ne.s32.totalorder %s692_s25, %s451_s13 }
  0x3f   : > { %v196_v18 = vrot.slane %v169_v11, 2  ;;  %v210_v20 = vrot.slane %v169_v11, 3  ;;  %v224_v22 = vrot.slane %v169_v11, 4  ;;  %v184_v25 = vrot.slane %v171_v13, 1  ;;  %p755_p9 = scmp.ne.s32.totalorder %s751_s19, 0  ;;  %s538_s9 = smov [#allocation5]  }
  0x40   : > { %v158_v7 = vrot.slane %v152_v4, %v157_v2  ;;  %v162_v14 = vrot.slane %v154_v6, %v161_v3  ;;  %v198_v26 = vrot.slane %v171_v13, 2  ;;  %v212_v29 = vrot.slane %v171_v13, 3  ;;  %s455_s15 = sshll.u32 %s538_s9, 4  ;;  %s456_s15 = int_to_ptr.vmem [resolvable:$false] %s455_s15 }
  0x41   : > { %v185_v30 = vsel %vm180_vm1, %v182_v16, %v184_v25  ;;  %v226_v32 = vrot.slane %v171_v13, 4  ;;  %p453_p11 = pnand %p452_p8, %p755_p9  ;;  %s457_s16 = scalar_lea.vmem %s456_s15, 768 }
  0x42   : > { %v176_v12 = vsel %vm166_vm0, %v158_v7, %v167_v8  ;;  %v199_v31 = vsel %vm194_vm2, %v196_v18, %v198_v26  ;;  %v177_v33 = vsel %vm166_vm0, %v170_v10, %v162_v14  ;;  %v192_v35 = vadd.f32 %v185_v30, %v169_v11  ;;  %p458_p5 = scmp.lt.s32.totalorder %s692_s25, %s456_s15  ;;  %p459_p13 = scmp.lt.s32.totalorder %s457_s16, %s451_s13 }
  0x43   : > { %v181_v15 = vrot.slane %v176_v12, 1  ;;  %v195_v17 = vrot.slane %v176_v12, 2  ;;  %v209_v19 = vrot.slane %v176_v12, 3  ;;  %v223_v21 = vrot.slane %v176_v12, 4  ;;  %p454_p0 = pneg %p453_p11 }
  0x44   : > { %v186_v36 = vrot.slane %v177_v33, 1  ;;  %v213_v38 = vsel %vm208_vm3, %v210_v20, %v212_v29  ;;  %v200_v39 = vrot.slane %v177_v33, 2  ;;  %v214_v40 = vrot.slane %v177_v33, 3  ;;  %p460_p2 = por %p459_p13, %p458_p5 }
  0x45   : > { %v183_v23 = vsel %vm180_vm1, %v181_v15, %v182_v16  ;;  %v197_v24 = vsel %vm194_vm2, %v195_v17, %v196_v18  ;;  %v211_v28 = vsel %vm208_vm3, %v209_v19, %v210_v20  ;;  %v225_v37 = vsel %vm222_vm4, %v223_v21, %v224_v22 }
  0x46   : > { %v191_v27 = vadd.f32 %v183_v23, %v176_v12  ;;  %v206_v42 = vadd.f32 %v199_v31, %v192_v35  ;;  %v187_v43 = vsel %vm180_vm1, %v184_v25, %v186_v36  ;;  %v228_v44 = vrot.slane %v177_v33, 4  ;;  %p461_p4 = pnand %p460_p2, %p454_p0 }
  0x47   : > { %v227_v45 = vsel %vm222_vm4, %v224_v22, %v226_v32  ;;  %v193_v46 = vadd.f32 %v187_v43, %v171_v13  ;;  %v201_v47 = vsel %vm194_vm2, %v198_v26, %v200_v39  ;;  %v215_v50 = vsel %vm208_vm3, %v212_v29, %v214_v40 }
  0x48   : > { %v205_v34 = vadd.f32 %v197_v24, %v191_v27  ;;  %v220_v49 = vadd.f32 %v213_v38, %v206_v42  ;;  %v229_v54 = vsel %vm222_vm4, %v226_v32, %v228_v44 }
  0x49   : > { %v207_v51 = vadd.f32 %v201_v47, %v193_v46 }
  0x4a   : > { %v219_v41 = vadd.f32 %v211_v28, %v205_v34  ;;  %v234_v53 = vadd.f32 %v227_v45, %v220_v49 }
  0x4b   : > { %v221_v55 = vadd.f32 %v215_v50, %v207_v51 }
  0x4c   : > { %v233_v48 = vadd.f32 %v225_v37, %v219_v41  ;;  %v237_v56 = vmul.f32 0.2, %v234_v53 }
  0x4d   : > { %v235_v57 = vadd.f32 %v229_v54, %v221_v55 }
  0x4e   : > { %v236_v52 = vmul.f32 0.2, %v233_v48  ;;  %240 = vst [vmem:[%s151_s18 + $0x8] sm:$0xff] %v237_v56 }
  0x4f   : > { %v238_v58 = vmul.f32 0.2, %v235_v57 }
  0x50   : > { %239 = vst [vmem:[%s151_s18] sm:$0xff] %v236_v52 }
  0x51   : > { %241 = vst [vmem:[%s151_s18 + $0x10] sm:$0xff] %v238_v58 }
  0x52   : > { %464 = shalt.err (!%p461_p4)
}
  0x53   : > { %s465_s17 = scalar_lea.hbm %s697_s5, 384  ;;  %s469_s24 = scalar_lea.hbm %s747_s1, 768 }
  0x54   : > { %p466_p6 = scmp.ne.s32.totalorder %s697_s5, %s465_s17  ;;  %p470_p12 = scmp.lt.u32.totalorder %s697_s5, %s747_s1 }
  0x55   : > { %p471_p1 = scmp.lt.u32.totalorder %s469_s24, %s465_s17  ;;  %p473_p8 = scmp.lt.u32.totalorder %s465_s17, %s697_s5 }
  0x56   : > { %p467_p7 = pnand %p466_p6, %p755_p9 }
  0x57   : > { %p472_p3 = por %p471_p1, %p470_p12 }
  0x58   : > { %p468_p10 = pneg %p467_p7 }
  0x59   : > { %p474_p11 = por %p473_p8, %p472_p3 }
  0x5b   : > { %p475_p0 = pnand %p474_p11, %p468_p10 }
  0x5d   : > { %478 = shalt.err (!%p475_p0)
}
  0x5e   : > { %s539_s3 = smov 128   ;;  %s540_s4 = smov 8  }
  0x5f   : > { %357 = dma.vmem_to_hbm [thread:$0]  (%p755_p9), %s692_s25, 384, %s697_s5, %s243_s12, %s539_s3, %s539_s3, %s540_s4  }
  0x60 PF: > { %s272_s18 = sand.u32 1, %s513_s6   ;;  %p756_p5 = scmp.ne.s32.totalorder %s752_s21, 0 }
  0x61   : > { %p757_p13 = scmp.ge.s32.totalorder %s533_s11, 2  ;;  %s273_s28 = scalar_lea.sflag [#allocation4], %s272_s18 }
  0x63   : > { %p364_p2 = pnand %p757_p13, %p756_p5 }
  0x65   : > { %508 = dma.done.wait (!%p364_p2), %s273_s28, 384  }
  0x66   : > { %510 = vsyncadd (!%p364_p2), %s273_s28, 4294966912  ;;  %s17_s11 = sadd.s32 1, %s533_s11   ;;  %s758_s6 = smov %s517_s7 }
  0x67   : > { %p14_p4 = scmp.ge.s32.totalorder %s17_s11, 4   ;;  %s759_s7 = smov %s521_s8 }
  0x68   : > { %s760_s8 = smov %s607_s20  ;;  %s761_s9 = smov %s529_s10 }
  0x69   : > { %s762_s10 = smov %s764_s14  ;;  %16 = sbr.rel (!%p14_p4) target bundleno = 6 (0x6), region = 69 }
  0x70   :  { %278 = vsyncpa [#allocation3], 1 }
  0x71   :  { %280 = vsyncpa [#allocation3 + $0x1], 1 }
  0x72   :  { %281 = vsyncpa [#allocation4], 1 }
  0x73   :  { %283 = vsyncpa [#allocation4 + $0x1], 1 }

</bundles_post_ra>
